<compile_context>
chip_gen: v7x
topology: tpu7x:2x2x1
jax: 0.10.0
libtpu: 0.0.40
codegen_flags: <defaults>
</compile_context>

<pallas_src>
import functools

import jax
import jax.numpy as jnp
from jax.experimental import pallas as pl
from jax.experimental.pallas import tpu as pltpu


def _acp_kernel(x_ref, avg_ref, max_ref, last_ref, sum_sc, max_sc, *,
                total_t: int, block_t: int, inv_t: float, last_local: int):
    """One (batch-tile, time-tile) grid step.

    x_ref:   (bB, C, bT) input tile (native dtype)
    avg/max/last_ref: (bB, C) outputs, resident across the time axis
    sum_sc:  (bB, C) f32 running sum
    max_sc:  (bB, C) native-dtype running max
    """
    t = pl.program_id(1)
    nt = pl.num_programs(1)

    x = x_ref[...]  # native dtype, no whole-tile upcast

    @pl.when(t == 0)
    def _init():
        sum_sc[...] = jnp.zeros_like(sum_sc)
        max_sc[...] = jnp.full_like(max_sc, -jnp.inf)

    if total_t % block_t != 0:
        # Last time block is partial: mask padded columns (0 for sum, -inf for
        # max).  Global time index of each lane in this block:
        tids = t * block_t + jax.lax.broadcasted_iota(
            jnp.int32, (1, 1, block_t), 2)
        valid = tids < total_t
        x_sum = jnp.where(valid, x, jnp.zeros((), dtype=x.dtype))
        x_max = jnp.where(valid, x, jnp.asarray(-jnp.inf, dtype=x.dtype))
    else:
        x_sum = x
        x_max = x

    # Accumulate: sum in f32, max in the input dtype.
    sum_sc[...] += jnp.sum(x_sum, axis=-1, dtype=jnp.float32)
    max_sc[...] = jnp.maximum(max_sc[...], jnp.max(x_max, axis=-1))

    @pl.when(t == nt - 1)
    def _finalize():
        # Mean uses the true T (not the padded extent).
        avg_ref[...] = (sum_sc[...] * inv_t).astype(avg_ref.dtype)
        max_ref[...] = max_sc[...].astype(max_ref.dtype)
        # The block containing T-1 is always the last T block; static index.
        last_ref[...] = x[:, :, last_local].astype(last_ref.dtype)


def adaptive_concat_pool_rnn(x: jax.Array, bidirectional: bool, *,
                             block_b: int | None = None,
                             block_t: int | None = None) -> jax.Array:
    """Pallas implementation of AdaptiveConcatPoolRNN.forward.

    Args:
      x: (B, C, T) array (channels-first, PyTorch NCW layout).
      bidirectional: module's __init__ flag.  NOTE: in the original PyTorch
        code the bidirectional branch slices x[:, channels:, 0] with
        channels == full channel count, i.e. an empty slice, so t3 is the last
        timestep of all channels in BOTH branches.  Reproduced faithfully; the
        flag therefore does not change the result.
      block_b / block_t: optional tile-size overrides (mainly for testing).

    Returns:
      (B, 3*C) array: [avg_pool, max_pool, last-step] concatenated on channels.
    """
    del bidirectional  # Dead branch in the original module (see docstring).

    B, C, T = x.shape
    itemsize = jnp.dtype(x.dtype).itemsize

    # Batch tile: 8 rows (sublane-aligned) when possible, else the full batch.
    if block_b is None:
        block_b = B if B < 8 else 8

    # Time tile: full T if it fits a ~4 MiB per-buffer budget, otherwise the
    # largest multiple of 128 that does (lane-aligned; partial last block is
    # masked in the kernel).  ~4 MiB * 2 (double-buffer) keeps v7x happy and
    # is already past the tile-size knee on v5e/v6e for a mem-bound kernel.
    if block_t is None:
        target_bytes = 4 * 1024 * 1024
        max_bt = max(128, (target_bytes // max(1, block_b * C * itemsize))
                     // 128 * 128)
        block_t = T if T <= max_bt else max_bt

    grid_b = pl.cdiv(B, block_b)
    grid_t = pl.cdiv(T, block_t)
    last_local = (T - 1) % block_t  # index of timestep T-1 inside last block

    kernel = functools.partial(
        _acp_kernel,
        total_t=T,
        block_t=block_t,
        inv_t=1.0 / T,
        last_local=last_local,
    )

    tile_bytes = block_b * C * block_t * itemsize
    vmem_limit = int(min(128 * 1024 * 1024,
                         max(32 * 1024 * 1024, 4 * tile_bytes)))

    grid_spec = pltpu.PrefetchScalarGridSpec(
        num_scalar_prefetch=0,
        grid=(grid_b, grid_t),
        in_specs=[
            pl.BlockSpec((block_b, C, block_t), lambda b, t: (b, 0, t)),
        ],
        out_specs=[
            pl.BlockSpec((block_b, C), lambda b, t: (b, 0)),  # avg (resident)
            pl.BlockSpec((block_b, C), lambda b, t: (b, 0)),  # max (resident)
            pl.BlockSpec((block_b, C), lambda b, t: (b, 0)),  # last (resident)
        ],
        scratch_shapes=[
            pltpu.VMEM((block_b, C), jnp.float32),  # running sum (f32)
            pltpu.VMEM((block_b, C), x.dtype),      # running max (native)
        ],
    )

    avg, mx, last = pl.pallas_call(
        kernel,
        out_shape=(
            jax.ShapeDtypeStruct((B, C), x.dtype),
            jax.ShapeDtypeStruct((B, C), x.dtype),
            jax.ShapeDtypeStruct((B, C), x.dtype),
        ),
        grid_spec=grid_spec,
        compiler_params=pltpu.CompilerParams(
            dimension_semantics=("parallel", "arbitrary"),
            vmem_limit_bytes=vmem_limit,
        ),
        cost_estimate=pl.CostEstimate(
            flops=2 * B * C * T,                 # sum + max over time
            transcendentals=0,
            bytes_accessed=B * C * T * itemsize + 3 * B * C * itemsize,
        ),
    )(x)

    # Cheap wrapper-side layout plumbing; matches PyTorch cat order.
    return jnp.concatenate([avg, mx, last], axis=1)


def _reference(x: jnp.ndarray, bidirectional: bool) -> jnp.ndarray:
    # Pure-JAX reference mirroring the PyTorch code exactly.
    t1 = jnp.mean(x.astype(jnp.float32), axis=-1).astype(x.dtype)
    t2 = jnp.max(x, axis=-1)
    if not bidirectional:
        t3 = x[:, :, -1]
    else:
        channels = x.shape[1]
        t3 = jnp.concatenate([x[:, :channels, -1], x[:, channels:, 0]], axis=1)
    return jnp.concatenate([t1, t2, t3], axis=1)


if __name__ == "__main__":
    key = jax.random.PRNGKey(0)
    ok = True

    # 1) Small shape consistent with the module (B, C, T); both flag values.
    B, C, T = 2, 4, 16
    x_small = jax.random.normal(key, (B, C, T), dtype=jnp.float32)
    for bidirectional in (False, True):
        out = adaptive_concat_pool_rnn(x_small, bidirectional)
        out = jax.block_until_ready(out)
        ref = _reference(x_small, bidirectional)
        assert out.shape == (B, 3 * C), out.shape
        if not jnp.allclose(out, ref, atol=1e-5, rtol=1e-5):
            ok = False

    # 2) Tiled path: forces multiple time blocks with a partial (masked) last
    #    block and an 8-row batch tile, exercising the accumulator pipeline.
    B2, C2, T2 = 8, 128, 300
    x_big = jax.random.normal(jax.random.PRNGKey(1), (B2, C2, T2),
                              dtype=jnp.float32)
    out2 = adaptive_concat_pool_rnn(x_big, False, block_t=128)
    out2 = jax.block_until_ready(out2)
    ref2 = _reference(x_big, False)
    assert out2.shape == (B2, 3 * C2), out2.shape
    if not jnp.allclose(out2, ref2, atol=1e-4, rtol=1e-4):
        ok = False

    if ok:
        print("KERNEL_OK")
</pallas_src>

<mosaic_0001>
module attributes {stable_mosaic.version = 11 : i64} {
  func.func @_acp_kernel(%arg0: i32, %arg1: i32, %arg2: memref<2x4x16xf32, #tpu.memory_space<vmem>>, %arg3: memref<2x4xf32, #tpu.memory_space<vmem>>, %arg4: memref<2x4xf32, #tpu.memory_space<vmem>>, %arg5: memref<2x4xf32, #tpu.memory_space<vmem>>, %arg6: memref<2x4xf32, #tpu.memory_space<vmem>>, %arg7: memref<2x4xf32, #tpu.memory_space<vmem>>) attributes {dimension_semantics = [#tpu.dimension_semantics<parallel>, #tpu.dimension_semantics<arbitrary>], iteration_bounds = array<i64: 1, 1>, scalar_prefetch = 0 : i64, scratch_operands = 2 : i64, tpu.core_type = #tpu.core_type<tc>, window_params = [{transform_indices = @transform_0, window_bounds = array<i64: 2, 4, 16>}, {transform_indices = @transform_1, window_bounds = array<i64: 2, 4>}, {transform_indices = @transform_2, window_bounds = array<i64: 2, 4>}, {transform_indices = @transform_3, window_bounds = array<i64: 2, 4>}]} {
    %c0 = arith.constant 0 : index
    %c0_0 = arith.constant 0 : index
    %c0_1 = arith.constant 0 : index
    %0 = vector.load %arg2[%c0, %c0_0, %c0_1] : memref<2x4x16xf32, #tpu.memory_space<vmem>>, vector<2x4x16xf32>
    %c0_i32 = arith.constant 0 : i32
    %1 = arith.cmpi eq, %arg1, %c0_i32 : i32
    %2 = arith.extui %1 : i1 to i32
    %c0_i32_2 = arith.constant 0 : i32
    %3 = arith.cmpi ne, %2, %c0_i32_2 : i32
    scf.if %3 {
      %cst_14 = arith.constant 0.000000e+00 : f32
      %15 = vector.broadcast %cst_14 : f32 to vector<2x4xf32>
      %c0_15 = arith.constant 0 : index
      %c0_16 = arith.constant 0 : index
      %16 = vector.load %arg6[%c0_15, %c0_16] : memref<2x4xf32, #tpu.memory_space<vmem>>, vector<2x4xf32>
      tpu.vector_store %arg6[%c0_15, %c0_16], %15 {strides = array<i32>} : memref<2x4xf32, #tpu.memory_space<vmem>>, vector<2x4xf32>,
      %cst_17 = arith.constant 0xFF800000 : f32
      %17 = vector.broadcast %cst_17 : f32 to vector<2x4xf32>
      %c0_18 = arith.constant 0 : index
      %c0_19 = arith.constant 0 : index
      %18 = vector.load %arg7[%c0_18, %c0_19] : memref<2x4xf32, #tpu.memory_space<vmem>>, vector<2x4xf32>
      tpu.vector_store %arg7[%c0_18, %c0_19], %17 {strides = array<i32>} : memref<2x4xf32, #tpu.memory_space<vmem>>, vector<2x4xf32>,
    } else {
    }
    %c0_3 = arith.constant 0 : index
    %c0_4 = arith.constant 0 : index
    %4 = vector.load %arg6[%c0_3, %c0_4] : memref<2x4xf32, #tpu.memory_space<vmem>>, vector<2x4xf32>
    %cst = arith.constant dense<0.000000e+00> : vector<2x4xf32>
    %5 = vector.multi_reduction <add>, %0, %cst [2] : vector<2x4x16xf32> to vector<2x4xf32>
    %6 = arith.addf %4, %5 : vector<2x4xf32>
    %c0_5 = arith.constant 0 : index
    %c0_6 = arith.constant 0 : index
    %7 = vector.load %arg6[%c0_5, %c0_6] : memref<2x4xf32, #tpu.memory_space<vmem>>, vector<2x4xf32>
    tpu.vector_store %arg6[%c0_5, %c0_6], %6 {strides = array<i32>} : memref<2x4xf32, #tpu.memory_space<vmem>>, vector<2x4xf32>,
    %c0_7 = arith.constant 0 : index
    %c0_8 = arith.constant 0 : index
    %8 = vector.load %arg7[%c0_7, %c0_8] : memref<2x4xf32, #tpu.memory_space<vmem>>, vector<2x4xf32>
    %cst_9 = arith.constant dense<0xFF800000> : vector<2x4xf32>
    %9 = vector.multi_reduction <maximumf>, %0, %cst_9 [2] : vector<2x4x16xf32> to vector<2x4xf32>
    %10 = arith.maximumf %8, %9 : vector<2x4xf32>
    %c0_10 = arith.constant 0 : index
    %c0_11 = arith.constant 0 : index
    %11 = vector.load %arg7[%c0_10, %c0_11] : memref<2x4xf32, #tpu.memory_space<vmem>>, vector<2x4xf32>
    tpu.vector_store %arg7[%c0_10, %c0_11], %10 {strides = array<i32>} : memref<2x4xf32, #tpu.memory_space<vmem>>, vector<2x4xf32>,
    %c0_i32_12 = arith.constant 0 : i32
    %12 = arith.cmpi eq, %arg1, %c0_i32_12 : i32
    %13 = arith.extui %12 : i1 to i32
    %c0_i32_13 = arith.constant 0 : i32
    %14 = arith.cmpi ne, %13, %c0_i32_13 : i32
    scf.if %14 {
      %c0_14 = arith.constant 0 : index
      %c0_15 = arith.constant 0 : index
      %15 = vector.load %arg6[%c0_14, %c0_15] : memref<2x4xf32, #tpu.memory_space<vmem>>, vector<2x4xf32>
      %cst_16 = arith.constant 6.250000e-02 : f32
      %16 = vector.broadcast %cst_16 : f32 to vector<2x4xf32>
      %17 = arith.mulf %15, %16 : vector<2x4xf32>
      %c0_17 = arith.constant 0 : index
      %c0_18 = arith.constant 0 : index
      %18 = vector.load %arg3[%c0_17, %c0_18] : memref<2x4xf32, #tpu.memory_space<vmem>>, vector<2x4xf32>
      tpu.vector_store %arg3[%c0_17, %c0_18], %17 {strides = array<i32>} : memref<2x4xf32, #tpu.memory_space<vmem>>, vector<2x4xf32>,
      %c0_19 = arith.constant 0 : index
      %c0_20 = arith.constant 0 : index
      %19 = vector.load %arg7[%c0_19, %c0_20] : memref<2x4xf32, #tpu.memory_space<vmem>>, vector<2x4xf32>
      %c0_21 = arith.constant 0 : index
      %c0_22 = arith.constant 0 : index
      %20 = vector.load %arg4[%c0_21, %c0_22] : memref<2x4xf32, #tpu.memory_space<vmem>>, vector<2x4xf32>
      tpu.vector_store %arg4[%c0_21, %c0_22], %19 {strides = array<i32>} : memref<2x4xf32, #tpu.memory_space<vmem>>, vector<2x4xf32>,
      %21 = vector.extract_strided_slice %0 {offsets = [0, 0, 15], sizes = [2, 4, 1], strides = [1, 1, 1]} : vector<2x4x16xf32> to vector<2x4x1xf32>
      %22 = vector.shape_cast %21 : vector<2x4x1xf32> to vector<2x4xf32>
      %c0_23 = arith.constant 0 : index
      %c0_24 = arith.constant 0 : index
      %23 = vector.load %arg5[%c0_23, %c0_24] : memref<2x4xf32, #tpu.memory_space<vmem>>, vector<2x4xf32>
      tpu.vector_store %arg5[%c0_23, %c0_24], %22 {strides = array<i32>} : memref<2x4xf32, #tpu.memory_space<vmem>>, vector<2x4xf32>,
    } else {
    }
    return
  }
  func.func @transform_0(%arg0: i32, %arg1: i32) -> (i32, i32, i32) {
    %c0_i32 = arith.constant 0 : i32
    %c0_i32_0 = arith.constant 0 : i32
    return %arg0, %c0_i32, %arg1 : i32, i32, i32
  }
  func.func @transform_1(%arg0: i32, %arg1: i32) -> (i32, i32) {
    %c0_i32 = arith.constant 0 : i32
    %c0_i32_0 = arith.constant 0 : i32
    return %arg0, %c0_i32 : i32, i32
  }
  func.func @transform_2(%arg0: i32, %arg1: i32) -> (i32, i32) {
    %c0_i32 = arith.constant 0 : i32
    %c0_i32_0 = arith.constant 0 : i32
    return %arg0, %c0_i32 : i32, i32
  }
  func.func @transform_3(%arg0: i32, %arg1: i32) -> (i32, i32) {
    %c0_i32 = arith.constant 0 : i32
    %c0_i32_0 = arith.constant 0 : i32
    return %arg0, %c0_i32 : i32, i32
  }
}

</mosaic_0001>

<bundles_post_ra>
// kernel: tpu_custom_call.1
= control target key start
LH: loop header
LB: loop body
LE: loop exit
PB: predicated region body
PF: predicated region fallthrough
CT: control target
= control target key end

     0   :  { %9 = vsyncpa [#allocation5], 0  ;;  %s358_s0 = inlined_call_operand.hbm [shape: f32[2,4,16], index: 0, kind: input, shape index: {}]   ;;  %s359_s1 = inlined_call_operand.hbm [shape: f32[2,4], index: 1, kind: output, shape index: {0}]   ;;  %s360_s2 = inlined_call_operand.hbm [shape: f32[2,4], index: 2, kind: output, shape index: {1}]   ;;  %s361_s3 = inlined_call_operand.hbm [shape: f32[2,4], index: 3, kind: output, shape index: {2}]  }
   0x1   :  { %10 = vsyncpa [#allocation6], 0 }
   0x2   :  { %11 = vsyncpa [#allocation9], 0  ;;  %s257_s12 = smov [#allocation4]   ;;  %s163_s16 = scalar_lea.hbm %s358_s0, 128 }
   0x3   :  { %s17_s13 = sshll.u32 %s257_s12, 4  ;;  %p164_p0 = scmp.ne.s32.totalorder %s358_s0, %s163_s16  ;;  %s18_s13 = int_to_ptr.vmem [resolvable:$true] %s17_s13 }
   0x4   :  { %p167_p1 = scmp.lt.u32.totalorder %s163_s16, %s358_s0 }
   0x6   :  { %p169_p2 = pnand %p167_p1, %p164_p0 }
   0x8   :  { %172 = shalt.err (!%p169_p2)
}
   0x9   :  { %s173_s21 = scalar_lea.vmem %s18_s13, 128  ;;  %p178_p4 = scmp.lt.s32.totalorder %s18_s13, %s18_s13 }
   0xa   :  { %p174_p3 = scmp.ne.s32.totalorder %s18_s13, %s173_s21  ;;  %p179_p5 = scmp.lt.s32.totalorder %s173_s21, %s173_s21 }
   0xc   :  { %p180_p6 = por %p179_p5, %p178_p4 }
   0xe   :  { %p181_p7 = pnand %p180_p6, %p174_p3 }
  0x10   :  { %184 = shalt.err (!%p181_p7)
}
  0x11   :  { %s258_s22 = smov 64   ;;  %s259_s23 = smov 4  }
  0x12   :  { %23 = dma.hbm_to_vmem [thread:$0]  %s358_s0, 128, %s18_s13, [#allocation5], %s258_s22, %s258_s22, %s259_s23  }
  0x13   :  { %251 = dma.done.wait [#allocation5], 128  }
  0x14   :  { %252 = vsyncadd [#allocation5], 4294967168  ;;  %v260_v0 = vmov 15   ;;  %vm37_vm0 = vcmask 125952   ;;  %v27_v1 = vld [vmem:[#allocation4] sm:$0xf]  ;;  %v46_v9 = vlaneseq }
  0x15   :  { %162 = vset.pattern.permute.xlu1 %v260_v0  ;;  %161 = vset.pattern.permute.xlu0 %v260_v0  ;;  %v28_v2 = vld [vmem:[#allocation4 + $0x4] sm:$0xf]  ;;  %v63_v3 = vsel %vm37_vm0, %v27_v1, -inf  ;;  %v38_v4 = vsel %vm37_vm0, %v27_v1, 0.0  ;;  %vm33_vm1 = vcmask 25600   ;;  %v261_v7 = vmov -inf  }
  0x16   :  { %64 = vmax.xlane.f32.xlu1 %v63_v3  ;;  %39 = vadd.xlane.f32.xlu0 %v38_v4  ;;  %v66_v5 = vsel %vm37_vm0, %v28_v2, -inf  ;;  %v41_v6 = vsel %vm37_vm0, %v28_v2, 0.0  ;;  %35 = vst.msk [vmem:[#allocation3] sm:$0x3] %vm33_vm1, %v261_v7  ;;  %v262_v8 = vmov 0.0   ;;  %v47_v10 = vand.u32 127, %v46_v9 }
  0x17   :  { %34 = vst.msk [vmem:[#allocation2] sm:$0x3] %vm33_vm1, %v262_v8  ;;  %v49_v11 = vshrl.u32 %v46_v9, 7  ;;  %vm56_vm2 = vcmask 1041409   ;;  %s263_s0 = smov [#allocation8]   ;;  %s264_s27 = smov [#allocation10]  }
  0x18   :  { %s126_s26 = sshll.u32 %s263_s0, 4  ;;  %s136_s28 = sshll.u32 %s264_s27, 4  ;;  %s127_s26 = int_to_ptr.vmem [resolvable:$true] %s126_s26  ;;  %s306_s28 = int_to_ptr.vmem [resolvable:$true] %s136_s28 }
  0x19   :  { %v50_v14 = vsub.s32 %v47_v10, %v49_v11  ;;  %s265_s29 = smov [#allocation7]   ;;  %s185_s4 = scalar_lea.vmem %s127_s26, 32 }
  0x1a   :  { %67 = vmax.xlane.f32.xlu1 %v66_v5  ;;  %42 = vadd.xlane.f32.xlu0 %v41_v6  ;;  %s116_s30 = sshll.u32 %s265_s29, 4  ;;  %p186_p8 = scmp.ne.s32.totalorder %s127_s26, %s185_s4  ;;  %s309_s30 = int_to_ptr.vmem [resolvable:$true] %s116_s30 }
  0x1b   :  { %p190_p9 = scmp.lt.s32.totalorder %s127_s26, %s127_s26  ;;  %p191_p10 = scmp.lt.s32.totalorder %s185_s4, %s185_s4 }
  0x1d   :  { %v62_v19 = vld [vmem:[#allocation3] sm:$0x3]  ;;  %p192_p11 = por %p191_p10, %p190_p9 }
  0x1e   :  { %v36_v21 = vld [vmem:[#allocation2] sm:$0x3] }
  0x1f   :  { %p193_p12 = pnand %p192_p11, %p186_p8 }
  0x2b   :  { %97 = vperm.xlu1 %162, %v28_v2  }
  0x30   :  { %94 = vperm.xlu0 %161, %v27_v1  }
  0xa3   :  { %v65_v12 = vpop.xlane.xlu1 %64  ;;  %v40_v13 = vpop.xlane.xlu0 %39 }
  0xa4   :  { %v74_v17 = vrot.slane %v65_v12, %v50_v14  ;;  %v51_v18 = vrot.slane %v40_v13, %v50_v14 }
  0xa7   :  { %v68_v15 = vpop.xlane.xlu1 %67  ;;  %v43_v16 = vpop.xlane.xlu0 %42 }
  0xa8   :  { %v78_v20 = vrot.slane %v68_v15, %v50_v14  ;;  %v55_v22 = vrot.slane %v43_v16, %v50_v14 }
  0xaa   :  { %v79_v23 = vsel %vm56_vm2, %v78_v20, %v74_v17  ;;  %v57_v24 = vsel %vm56_vm2, %v55_v22, %v51_v18 }
  0xab   :  { %v81_v25 = vmax.f32 %v62_v19, %v79_v23  ;;  %v59_v26 = vadd.f32 %v57_v24, %v36_v21  ;;  %v98_v27 = vpop.permute.xlu1 %97 }
  0xac   :  { %v106_v28 = vrot.slane %v98_v27, %v50_v14 }
  0xad   :  { %82 = vst.msk [vmem:[#allocation3] sm:$0x3] %vm33_vm1, %v81_v25  ;;  %61 = vst.msk [vmem:[#allocation2] sm:$0x3] %vm33_vm1, %v59_v26 }
  0xaf   :  { %v95_v29 = vpop.permute.xlu0 %94 }
  0xb0   :  { %v102_v30 = vrot.slane %v95_v29, %v50_v14 }
  0xb2   :  { %v107_v31 = vsel %vm56_vm2, %v106_v28, %v102_v30 }
  0xb3   :  { %109 = vst.msk [vmem:[#allocation10] sm:$0x3] %vm33_vm1, %v107_v31 }
  0xb4   :  { %v89_v32 = vld [vmem:[#allocation3] sm:$0x3]  ;;  %v86_v33 = vld [vmem:[#allocation2] sm:$0x3] }
  0xb5   :  { %90 = vst.msk [vmem:[#allocation8] sm:$0x3] %vm33_vm1, %v89_v32  ;;  %v87_v34 = vmul.f32 0.0625, %v86_v33 }
  0xb6   :  { %196 = shalt.err (!%p193_p12)
}
  0xb7   :  { %s197_s7 = scalar_lea.hbm %s360_s2, 32 }
  0xb8   :  { %p198_p13 = scmp.ne.s32.totalorder %s360_s2, %s197_s7  ;;  %p201_p0 = scmp.lt.u32.totalorder %s197_s7, %s360_s2 }
  0xba   :  { %p203_p1 = pnand %p201_p0, %p198_p13 }
  0xbc   :  { %206 = shalt.err (!%p203_p1)
}
  0xbd   :  { %129 = dma.vmem_to_hbm [thread:$0]  %s127_s26, 32, %s360_s2, [#allocation9]   ;;  %88 = vst.msk [vmem:[#allocation7] sm:$0x3] %vm33_vm1, %v87_v34 }
  0xbe   :  { %s207_s14 = scalar_lea.vmem %s306_s28, 32  ;;  %p212_p3 = scmp.lt.s32.totalorder %s306_s28, %s306_s28 }
  0xbf   :  { %p208_p2 = scmp.ne.s32.totalorder %s306_s28, %s207_s14  ;;  %p213_p4 = scmp.lt.s32.totalorder %s207_s14, %s207_s14 }
  0xc1   :  { %p214_p5 = por %p213_p4, %p212_p3 }
  0xc3   :  { %p215_p6 = pnand %p214_p5, %p208_p2 }
  0xc5   :  { %218 = shalt.err (!%p215_p6)
}
  0xc6   :  { %s219_s17 = scalar_lea.hbm %s361_s3, 32 }
  0xc7   :  { %p220_p7 = scmp.ne.s32.totalorder %s361_s3, %s219_s17  ;;  %p223_p8 = scmp.lt.u32.totalorder %s219_s17, %s361_s3 }
  0xc9   :  { %p225_p9 = pnand %p223_p8, %p220_p7 }
  0xcb   :  { %228 = shalt.err (!%p225_p9)
}
  0xcc   :  { %139 = dma.vmem_to_hbm [thread:$0]  %s306_s28, 32, %s361_s3, [#allocation9]  }
  0xcd   :  { %s229_s23 = scalar_lea.vmem %s309_s30, 32  ;;  %p234_p11 = scmp.lt.s32.totalorder %s309_s30, %s309_s30 }
  0xce   :  { %p230_p10 = scmp.ne.s32.totalorder %s309_s30, %s229_s23  ;;  %p235_p12 = scmp.lt.s32.totalorder %s229_s23, %s229_s23 }
  0xd0   :  { %p236_p13 = por %p235_p12, %p234_p11 }
  0xd2   :  { %p237_p0 = pnand %p236_p13, %p230_p10 }
  0xd4   :  { %240 = shalt.err (!%p237_p0)
}
  0xd5   :  { %s241_s0 = scalar_lea.hbm %s359_s1, 32 }
  0xd6   :  { %p242_p1 = scmp.ne.s32.totalorder %s359_s1, %s241_s0  ;;  %p245_p2 = scmp.lt.u32.totalorder %s241_s0, %s359_s1 }
  0xd8   :  { %p247_p3 = pnand %p245_p2, %p242_p1 }
  0xda   :  { %250 = shalt.err (!%p247_p3)
}
  0xdb   :  { %119 = dma.vmem_to_hbm [thread:$0]  %s309_s30, 32, %s359_s1, [#allocation6]  }
  0xdc   :  { %253 = dma.done.wait [#allocation6], 32  }
  0xdd   :  { %254 = vsyncadd [#allocation6], 4294967264 }
  0xde   :  { %255 = dma.done.wait [#allocation9], 64  }
  0xdf   :  { %256 = vsyncadd [#allocation9], 4294967232 }
  0xe0   :  { %149 = vsyncpa [#allocation5], 1 }
  0xe1   :  { %150 = vsyncpa [#allocation6], 1 }
  0xe2   :  { %151 = vsyncpa [#allocation9], 1 }

</bundles_post_ra>
